<compile_context>
chip_gen: v6e
topology: v6e:2x2x1
jax: 0.10.0
libtpu: 0.0.40
codegen_flags: <defaults>
</compile_context>

<pallas_src>
import functools
import math

import jax
import jax.numpy as jnp
import numpy as np
from jax.experimental import pallas as pl
from jax.experimental.pallas import tpu as pltpu

_EPS = 1e-5
_MAX_FAT_WIDTH = 2048   # cap on lcm(C, 128): widest lane-dense fat row we build
_GROUP_PAD = 128        # per-group stats are padded to a full 128-lane vector


def _round_up(n, m):
    return ((n + m - 1) // m) * m


def _pick_tile_rows(n_rows, n_cols):
    """Row tile: ~2 MiB per f32 buffer, multiple of 8, grid kept >= ~8 steps."""
    if n_rows <= 8:
        return max(n_rows, 1)                       # full-extent block, grid = 1
    lane_c = _round_up(n_cols, 128)                 # lane axis pads to 128
    target_bytes = 2 * 1024 * 1024                  # keep modest: v5e default scoped
    t = max(8, target_bytes // (lane_c * 4))        # VMEM is 16 MiB, v7x VMEM is 64 MiB
    # Keep the grid >= ~8 steps so v7x's two TensorCores both get work and the
    # input/output DMA pipeline has steps to overlap.
    t = min(t, max(8, _round_up(pl.cdiv(n_rows, 8), 8)))
    t = (t // 8) * 8
    return max(8, min(t, _round_up(n_rows, 8)))


# -----------------------------------------------------------------------------
# Path 1: rowwise kernel.  Used when C is already a multiple of 128 (lane-dense
# as-is) or as a fallback for awkward C where the repack would be too wide.
# -----------------------------------------------------------------------------
def _rowwise_kernel(x_ref, w_ref, o_ref, *, inv_c):
    xf = x_ref[...].astype(jnp.float32)
    mean = jnp.sum(xf, axis=-1, keepdims=True) * inv_c
    d = xf - mean
    var = jnp.sum(d * d, axis=-1, keepdims=True) * inv_c    # centered, unbiased=False
    scale = jax.lax.rsqrt(var + _EPS) * w_ref[...]          # (T,1)*(1,C) -> (T,C)
    o_ref[...] = (xf * scale).astype(o_ref.dtype)           # x NOT mean-centered


def _run_rowwise(x2d, w_f32, tile_rows):
    R, C = x2d.shape
    if tile_rows is None:
        tile_rows = _pick_tile_rows(R, C)
    kernel = functools.partial(_rowwise_kernel, inv_c=1.0 / C)
    return pl.pallas_call(
        kernel,
        out_shape=jax.ShapeDtypeStruct((R, C), x2d.dtype),
        grid_spec=pltpu.PrefetchScalarGridSpec(
            num_scalar_prefetch=0,
            grid=(pl.cdiv(R, tile_rows),),          # ragged last block: rows are
            in_specs=[                              # independent, OOB writes dropped
                pl.BlockSpec((tile_rows, C), lambda i: (i, 0)),
                pl.BlockSpec((1, C), lambda i: (0, 0)),      # resident weight
            ],
            out_specs=pl.BlockSpec((tile_rows, C), lambda i: (i, 0)),
        ),
        compiler_params=pltpu.CompilerParams(dimension_semantics=("parallel",)),
    )(x2d, w_f32.reshape(1, C))


# -----------------------------------------------------------------------------
# Path 2: lane-dense repack.  G = lcm(C,128)/C logical rows per 128-aligned
# "fat" row; segment statistics via small single-pass bf16 MXU matmuls.
# -----------------------------------------------------------------------------
def _dense_kernel(x_ref, w_ref, s_ref, st_ref, o_ref, *, inv_c):
    # x_ref : (T, GC)   input dtype; each fat row = G logical rows of C channels
    # w_ref : (1, GC)   f32 weight tiled G times                      (resident)
    # s_ref : (GC, 128) bf16 0/1 segment indicator (column g = seg g) (resident)
    # st_ref: (128, GC) bf16 transpose of s_ref                       (resident)
    f32, bf16 = jnp.float32, jnp.bfloat16
    xf = x_ref[...].astype(f32)
    s = s_ref[...]
    st = st_ref[...]

    # (1) Approximate per-segment mean, used only as a centering shift k:
    #     one bf16 MXU pass to reduce, one to broadcast back to lanes.
    s1 = jnp.dot(xf.astype(bf16), s, preferred_element_type=f32)            # (T, 128)
    k = jnp.dot((s1 * inv_c).astype(bf16), st, preferred_element_type=f32)  # (T, GC)

    # (2) Centered moments of d = x - k.  var = E[d^2] - E[d]^2 is exact for any
    #     per-segment constant k, so the bf16 rounding of k cancels out.  d^2 is
    #     split hi/lo so two single-pass bf16 matmuls give ~f32-accurate sums.
    d = xf - k
    p = d * d
    p_hi = p.astype(bf16)
    p_lo = (p - p_hi.astype(f32)).astype(bf16)
    s2 = (jnp.dot(p_hi, s, preferred_element_type=f32)
          + jnp.dot(p_lo, s, preferred_element_type=f32))                   # (T, 128)
    sd = jnp.dot(d.astype(bf16), s, preferred_element_type=f32)             # (T, 128)
    mean_d = sd * inv_c
    var = jnp.maximum(s2 * inv_c - mean_d * mean_d, 0.0)

    # (3) Per-segment rstd, broadcast back to lanes with a hi/lo split (2 bf16
    #     passes) so the replicated values keep ~f32 precision.  Columns >= G
    #     hold junk but multiply all-zero rows of st, so they never reach lanes.
    rstd = jax.lax.rsqrt(var + _EPS)                                        # (T, 128)
    r_hi = rstd.astype(bf16)
    r_lo = (rstd - r_hi.astype(f32)).astype(bf16)
    rstd_lanes = (jnp.dot(r_hi, st, preferred_element_type=f32)
                  + jnp.dot(r_lo, st, preferred_element_type=f32))          # (T, GC)

    # BiasFree LayerNorm: x is NOT mean-centered in the output.
    o_ref[...] = (xf * rstd_lanes * w_ref[...]).astype(o_ref.dtype)


def _run_dense(x2d, w_f32, tile_rows, gc, g):
    R, C = x2d.shape
    r_pad = _round_up(R, g)
    if r_pad != R:
        # TODO(synk): rare case (R % G != 0) — zero-pad rows (extra HBM copy of x).
        x2d = jnp.pad(x2d, ((0, r_pad - R), (0, 0)))
    rf = r_pad // g
    x_fat = x2d.reshape(rf, gc)                      # pure row-major view, no copy
    if tile_rows is None:
        tile_rows = _pick_tile_rows(rf, gc)

    w_fat = jnp.tile(w_f32, (g,)).reshape(1, gc)     # lane j gets weight[j % C]

    lane = np.arange(gc)
    seg = ((lane // C)[:, None] == np.arange(_GROUP_PAD)[None, :]).astype(np.float32)
    s_mat = jnp.asarray(seg, dtype=jnp.bfloat16)      # (GC, 128): reduce lanes->groups
    st_mat = jnp.asarray(seg.T, dtype=jnp.bfloat16)   # (128, GC): broadcast groups->lanes

    kernel = functools.partial(_dense_kernel, inv_c=1.0 / C)
    out = pl.pallas_call(
        kernel,
        out_shape=jax.ShapeDtypeStruct((rf, gc), x2d.dtype),
        grid_spec=pltpu.PrefetchScalarGridSpec(
            num_scalar_prefetch=0,
            grid=(pl.cdiv(rf, tile_rows),),           # ragged last block is fine
            in_specs=[
                pl.BlockSpec((tile_rows, gc), lambda i: (i, 0)),
                pl.BlockSpec((1, gc), lambda i: (0, 0)),            # resident
                pl.BlockSpec((gc, _GROUP_PAD), lambda i: (0, 0)),   # resident
                pl.BlockSpec((_GROUP_PAD, gc), lambda i: (0, 0)),   # resident
            ],
            out_specs=pl.BlockSpec((tile_rows, gc), lambda i: (i, 0)),
        ),
        compiler_params=pltpu.CompilerParams(dimension_semantics=("parallel",)),
    )(x_fat, w_fat, s_mat, st_mat)

    out = out.reshape(r_pad, C)
    return out[:R] if r_pad != R else out


# -----------------------------------------------------------------------------
# Public wrapper (matches BiasFree_LayerNorm.forward).
# -----------------------------------------------------------------------------
def bias_free_layer_norm(x, weight, *, tile_rows=None):
    """x: (..., C), weight: (C,).  Returns the same shape/dtype as x."""
    orig_shape = x.shape
    C = orig_shape[-1]
    assert weight.shape == (C,)
    x2d = x.reshape(-1, C)
    R = x2d.shape[0]
    w_f32 = weight.astype(jnp.float32)

    gc = (C * 128) // math.gcd(C, 128)               # lcm(C, 128)
    g = gc // C
    if g > 1 and gc <= _MAX_FAT_WIDTH and R >= 8 * g:
        out = _run_dense(x2d, w_f32, tile_rows, gc, g)
    else:
        out = _run_rowwise(x2d, w_f32, tile_rows)
    return out.reshape(orig_shape)


def _reference(x, weight):
    xf = x.astype(jnp.float32)
    sigma = jnp.var(xf, axis=-1, keepdims=True)
    return (xf / jnp.sqrt(sigma + _EPS) * weight.astype(jnp.float32)).astype(x.dtype)


if __name__ == "__main__":
    key = jax.random.PRNGKey(0)
    k1, k2, k3, k4, k5, k6, k7, k8 = jax.random.split(key, 8)

    def _check(x, w, out, atol=1e-5, rtol=5e-5):
        ref = _reference(x, w)
        assert out.shape == x.shape and out.dtype == x.dtype
        err = float(jnp.max(jnp.abs(out - ref)))
        assert jnp.allclose(out, ref, atol=atol, rtol=rtol), err

    # Case 1: Restormer-like (B, H*W, C) with C=48 -> lane-dense path (G=8),
    # with a non-zero mean to exercise the centered-variance numerics.
    x1 = jax.random.normal(k1, (2, 64, 48), dtype=jnp.float32) + 0.7
    w1 = 1.0 + 0.1 * jax.random.normal(k2, (48,), dtype=jnp.float32)
    o1 = jax.block_until_ready(bias_free_layer_norm(x1, w1))
    _check(x1, w1, o1)

    # Case 2: C=32 (G=4), row count not a multiple of G (exercises padding) and
    # an explicit tile size so the fat-row grid has a ragged last block.
    x2 = 1.5 + 2.0 * jax.random.normal(k3, (3, 37, 32), dtype=jnp.float32)
    w2 = 1.0 + 0.1 * jax.random.normal(k4, (32,), dtype=jnp.float32)
    o2 = jax.block_until_ready(bias_free_layer_norm(x2, w2, tile_rows=16))
    _check(x2, w2, o2)

    # Case 3: C=128 (already lane-dense) -> rowwise centered kernel.
    x3 = jax.random.normal(k5, (2, 16, 128), dtype=jnp.float32)
    w3 = 1.0 + 0.1 * jax.random.normal(k6, (128,), dtype=jnp.float32)
    o3 = jax.block_until_ready(bias_free_layer_norm(x3, w3))
    _check(x3, w3, o3)

    # Case 4: awkward C (lcm(C,128) too wide) -> rowwise fallback path.
    x4 = jax.random.normal(k7, (2, 5, 100), dtype=jnp.float32) - 0.5
    w4 = 1.0 + 0.1 * jax.random.normal(k8, (100,), dtype=jnp.float32)
    o4 = jax.block_until_ready(bias_free_layer_norm(x4, w4))
    _check(x4, w4, o4)

    print("KERNEL_OK")
</pallas_src>

<mosaic_0001>
module attributes {stable_mosaic.version = 11 : i64} {
  func.func @_dense_kernel(%arg0: i32, %arg1: memref<8x384xf32, #tpu.memory_space<vmem>>, %arg2: memref<1x384xf32, #tpu.memory_space<vmem>>, %arg3: memref<384x128xbf16, #tpu.memory_space<vmem>>, %arg4: memref<128x384xbf16, #tpu.memory_space<vmem>>, %arg5: memref<8x384xf32, #tpu.memory_space<vmem>>) attributes {dimension_semantics = [#tpu.dimension_semantics<parallel>], iteration_bounds = array<i64: 2>, scalar_prefetch = 0 : i64, scratch_operands = 0 : i64, tpu.core_type = #tpu.core_type<tc>, window_params = [{transform_indices = @transform_0, window_bounds = array<i64: 8, 384>}, {pipeline_mode = #tpu.pipeline_mode<synchronous>, transform_indices = @transform_1, window_bounds = array<i64: 1, 384>}, {pipeline_mode = #tpu.pipeline_mode<synchronous>, transform_indices = @transform_2, window_bounds = array<i64: 384, 128>}, {pipeline_mode = #tpu.pipeline_mode<synchronous>, transform_indices = @transform_3, window_bounds = array<i64: 128, 384>}, {transform_indices = @transform_4, window_bounds = array<i64: 8, 384>}]} {
    %c0 = arith.constant 0 : index
    %c0_0 = arith.constant 0 : index
    %0 = vector.load %arg1[%c0, %c0_0] : memref<8x384xf32, #tpu.memory_space<vmem>>, vector<8x384xf32>
    %c0_1 = arith.constant 0 : index
    %c0_2 = arith.constant 0 : index
    %1 = vector.load %arg3[%c0_1, %c0_2] : memref<384x128xbf16, #tpu.memory_space<vmem>>, vector<384x128xbf16>
    %c0_3 = arith.constant 0 : index
    %c0_4 = arith.constant 0 : index
    %2 = vector.load %arg4[%c0_3, %c0_4] : memref<128x384xbf16, #tpu.memory_space<vmem>>, vector<128x384xbf16>
    %3 = arith.truncf %0 : vector<8x384xf32> to vector<8x384xbf16>
    %cst = arith.constant dense<0.000000e+00> : vector<8x128xf32>
    %4 = tpu.matmul %3, %1, %cst {dimension_numbers = #tpu.dot_dimension_numbers<[1], [0], [0], [1], [0, 0, 1, 1], [], []>} : vector<8x384xbf16>, vector<384x128xbf16>, vector<8x128xf32> -> vector<8x128xf32>
    %cst_5 = arith.constant 0.020833334 : f32
    %5 = vector.broadcast %cst_5 : f32 to vector<8x128xf32>
    %6 = arith.mulf %4, %5 : vector<8x128xf32>
    %7 = arith.truncf %6 : vector<8x128xf32> to vector<8x128xbf16>
    %cst_6 = arith.constant dense<0.000000e+00> : vector<8x384xf32>
    %8 = tpu.matmul %7, %2, %cst_6 {dimension_numbers = #tpu.dot_dimension_numbers<[1], [0], [0], [1], [0, 0, 1, 1], [], []>} : vector<8x128xbf16>, vector<128x384xbf16>, vector<8x384xf32> -> vector<8x384xf32>
    %9 = arith.subf %0, %8 : vector<8x384xf32>
    %10 = arith.mulf %9, %9 : vector<8x384xf32>
    %11 = arith.truncf %10 : vector<8x384xf32> to vector<8x384xbf16>
    %12 = arith.extf %11 : vector<8x384xbf16> to vector<8x384xf32>
    %13 = arith.subf %10, %12 : vector<8x384xf32>
    %14 = arith.truncf %13 : vector<8x384xf32> to vector<8x384xbf16>
    %cst_7 = arith.constant dense<0.000000e+00> : vector<8x128xf32>
    %15 = tpu.matmul %11, %1, %cst_7 {dimension_numbers = #tpu.dot_dimension_numbers<[1], [0], [0], [1], [0, 0, 1, 1], [], []>} : vector<8x384xbf16>, vector<384x128xbf16>, vector<8x128xf32> -> vector<8x128xf32>
    %cst_8 = arith.constant dense<0.000000e+00> : vector<8x128xf32>
    %16 = tpu.matmul %14, %1, %cst_8 {dimension_numbers = #tpu.dot_dimension_numbers<[1], [0], [0], [1], [0, 0, 1, 1], [], []>} : vector<8x384xbf16>, vector<384x128xbf16>, vector<8x128xf32> -> vector<8x128xf32>
    %17 = arith.addf %15, %16 : vector<8x128xf32>
    %18 = arith.truncf %9 : vector<8x384xf32> to vector<8x384xbf16>
    %cst_9 = arith.constant dense<0.000000e+00> : vector<8x128xf32>
    %19 = tpu.matmul %18, %1, %cst_9 {dimension_numbers = #tpu.dot_dimension_numbers<[1], [0], [0], [1], [0, 0, 1, 1], [], []>} : vector<8x384xbf16>, vector<384x128xbf16>, vector<8x128xf32> -> vector<8x128xf32>
    %cst_10 = arith.constant 0.020833334 : f32
    %20 = vector.broadcast %cst_10 : f32 to vector<8x128xf32>
    %21 = arith.mulf %19, %20 : vector<8x128xf32>
    %cst_11 = arith.constant 0.020833334 : f32
    %22 = vector.broadcast %cst_11 : f32 to vector<8x128xf32>
    %23 = arith.mulf %17, %22 : vector<8x128xf32>
    %24 = arith.mulf %21, %21 : vector<8x128xf32>
    %25 = arith.subf %23, %24 : vector<8x128xf32>
    %cst_12 = arith.constant 0.000000e+00 : f32
    %26 = vector.broadcast %cst_12 : f32 to vector<8x128xf32>
    %27 = arith.maximumf %25, %26 : vector<8x128xf32>
    %cst_13 = arith.constant 9.99999974E-6 : f32
    %28 = vector.broadcast %cst_13 : f32 to vector<8x128xf32>
    %29 = arith.addf %27, %28 : vector<8x128xf32>
    %30 = math.rsqrt %29 : vector<8x128xf32>
    %31 = arith.truncf %30 : vector<8x128xf32> to vector<8x128xbf16>
    %32 = arith.extf %31 : vector<8x128xbf16> to vector<8x128xf32>
    %33 = arith.subf %30, %32 : vector<8x128xf32>
    %34 = arith.truncf %33 : vector<8x128xf32> to vector<8x128xbf16>
    %cst_14 = arith.constant dense<0.000000e+00> : vector<8x384xf32>
    %35 = tpu.matmul %31, %2, %cst_14 {dimension_numbers = #tpu.dot_dimension_numbers<[1], [0], [0], [1], [0, 0, 1, 1], [], []>} : vector<8x128xbf16>, vector<128x384xbf16>, vector<8x384xf32> -> vector<8x384xf32>
    %cst_15 = arith.constant dense<0.000000e+00> : vector<8x384xf32>
    %36 = tpu.matmul %34, %2, %cst_15 {dimension_numbers = #tpu.dot_dimension_numbers<[1], [0], [0], [1], [0, 0, 1, 1], [], []>} : vector<8x128xbf16>, vector<128x384xbf16>, vector<8x384xf32> -> vector<8x384xf32>
    %37 = arith.addf %35, %36 : vector<8x384xf32>
    %38 = arith.mulf %0, %37 : vector<8x384xf32>
    %c0_16 = arith.constant 0 : index
    %c0_17 = arith.constant 0 : index
    %39 = vector.load %arg2[%c0_16, %c0_17] : memref<1x384xf32, #tpu.memory_space<vmem>>, vector<1x384xf32>
    %40 = vector.broadcast %39 : vector<1x384xf32> to vector<8x384xf32>
    %41 = arith.mulf %38, %40 : vector<8x384xf32>
    %c0_18 = arith.constant 0 : index
    %c0_19 = arith.constant 0 : index
    %42 = vector.load %arg5[%c0_18, %c0_19] : memref<8x384xf32, #tpu.memory_space<vmem>>, vector<8x384xf32>
    tpu.vector_store %arg5[%c0_18, %c0_19], %41 {strides = array<i32>} : memref<8x384xf32, #tpu.memory_space<vmem>>, vector<8x384xf32>,
    return
  }
  func.func @transform_0(%arg0: i32) -> (i32, i32) {
    %c0_i32 = arith.constant 0 : i32
    %c0_i32_0 = arith.constant 0 : i32
    return %arg0, %c0_i32 : i32, i32
  }
  func.func @transform_1(%arg0: i32) -> (i32, i32) {
    %c0_i32 = arith.constant 0 : i32
    %c0_i32_0 = arith.constant 0 : i32
    %c0_i32_1 = arith.constant 0 : i32
    return %c0_i32, %c0_i32_0 : i32, i32
  }
  func.func @transform_2(%arg0: i32) -> (i32, i32) {
    %c0_i32 = arith.constant 0 : i32
    %c0_i32_0 = arith.constant 0 : i32
    %c0_i32_1 = arith.constant 0 : i32
    return %c0_i32, %c0_i32_0 : i32, i32
  }
  func.func @transform_3(%arg0: i32) -> (i32, i32) {
    %c0_i32 = arith.constant 0 : i32
    %c0_i32_0 = arith.constant 0 : i32
    %c0_i32_1 = arith.constant 0 : i32
    return %c0_i32, %c0_i32_0 : i32, i32
  }
  func.func @transform_4(%arg0: i32) -> (i32, i32) {
    %c0_i32 = arith.constant 0 : i32
    %c0_i32_0 = arith.constant 0 : i32
    return %arg0, %c0_i32 : i32, i32
  }
}

</mosaic_0001>

<bundles_post_ra>
// kernel: tpu_custom_call.1
= control target key start
LH: loop header
LB: loop body
LE: loop exit
PB: predicated region body
PF: predicated region fallthrough
CT: control target
= control target key end

     0   :  { %9 = vsyncpa [#allocation3], 0  ;;  %s2628_s0 = inlined_call_operand.hbm [shape: f32[16,384], index: 0, kind: input, shape index: {}]   ;;  %s2629_s1 = inlined_call_operand.hbm [shape: f32[1,384], index: 1, kind: input, shape index: {}]   ;;  %s2630_s2 = inlined_call_operand.hbm [shape: bf16[384,128], index: 2, kind: input, shape index: {}]   ;;  %s2631_s3 = inlined_call_operand.hbm [shape: bf16[128,384], index: 3, kind: input, shape index: {}]   ;;  %s2632_s4 = inlined_call_operand.hbm [shape: f32[16,384], index: 4, kind: output, shape index: {}]  }
   0x1   :  { %11 = vsyncpa [#allocation3 + $0x1], 0 }
   0x2   :  { %12 = vsyncpa [#allocation6], 0 }
   0x3   :  { %13 = vsyncpa [#allocation9], 0 }
   0x4   :  { %14 = vsyncpa [#allocation4], 0 }
   0x5   :  { %16 = vsyncpa [#allocation4 + $0x1], 0  ;;  %s2068_s15 = smov 0   ;;  %s2070_s16 = smov 0  }
   0x6   :  { %s2072_s17 = smov 0   ;;  %s2074_s18 = smov 0  }
   0x7 LB: > { %s2089_s19 = sadd.s32 4294967295, %s2029_s18   ;;  %s1352_s20 = sadd.s32 4294967294, %s2029_s18   ;;  %s2029_s18 = sphi %s2074_s18, %s2695_s18   ;;  %s2025_s17 = sphi %s2072_s17, %s2694_s17   ;;  %s2021_s16 = sphi %s2070_s16, %s2693_s16   ;;  %s2017_s15 = sphi %s2068_s15, %s2692_s15  }
   0x8   : > { %p42_p0 = scmp.ne.s32.totalorder %s2021_s16, %s2017_s15  ;;  %p2633_p1 = scmp.eq.s32.totalorder %s2089_s19, 0 }
   0x9   : > { %p129_p2 = scmp.eq.s32.totalorder %s2089_s19, 1  ;;  %p135_p3 = scmp.eq.s32.totalorder %s1352_s20, 1 }
   0xa   : > { %p2098_p4 = por %p2633_p1, %p42_p0  ;;  %p1353_p5 = scmp.ge.s32.totalorder %s2029_s18, 1 }
   0xb   : > { %p2103_p6 = por %p135_p3, %p42_p0  ;;  %p142_p7 = scmp.lt.s32.totalorder %s2029_s18, 3 }
   0xc   : > { %s2657_s21 = scalar_select %p2098_p4, 1, 0 }
   0xd   : > { %s2658_s22 = scalar_select %p2103_p6, 1, 0 }
   0xe   : > { %p2108_p8 = pnand %p1353_p5, %p142_p7  ;;  %s2031_s24 = smov [#allocation5]  }
   0xf   : > { %s155_s25 = sshll.u32 %s2031_s24, 4  ;;  %s2032_s26 = smov [#allocation7]   ;;  %s156_s25 = int_to_ptr.vmem [resolvable:$true] %s155_s25 }
  0x10   : > { %s2659_s23 = scalar_select %p2108_p8, 1, 0 }
  0x11   : > { %p1725_p10 = pneg %p2108_p8  ;;  %s165_s27 = sshll.u32 %s2032_s26, 4  ;;  %s2121_s27 = int_to_ptr.vmem [resolvable:$true] %s165_s27 }
  0x12   : > { %s2033_s29 = smov [#allocation8]   ;;  %s1862_s5 = scalar_lea.vmem %s156_s25, 48 }
  0x13   : > { %p2117_p11 = pnand %p1725_p10, %p2633_p1  ;;  %s178_s30 = sshll.u32 %s2033_s29, 4  ;;  %s179_s30 = int_to_ptr.vmem [resolvable:$true] %s178_s30 }
  0x14   : > { %p1863_p13 = scmp.ne.s32.totalorder %s156_s25, %s1862_s5  ;;  %s1869_s6 = scalar_lea.vmem %s156_s25, 64 }
  0x15   : > { %p1853_p12 = pneg %p2117_p11  ;;  %p1870_p5 = scmp.lt.s32.totalorder %s156_s25, %s156_s25 }
  0x16   : > { %p1871_p7 = scmp.lt.s32.totalorder %s1869_s6, %s1862_s5 }
  0x17   : > { %p1865_p0 = pnand %p1863_p13, %p1853_p12 }
  0x18   : > { %p1872_p10 = por %p1871_p7, %p1870_p5 }
  0x19   : > { %p1866_p3 = pneg %p1865_p0 }
  0x1b   : > { %p1873_p9 = pnand %p1872_p10, %p1866_p3 }
  0x1d   : > { %1876 = shalt.err (!%p1873_p9)
}
  0x1e   : > { %1728 = dma.hbm_to_vmem [thread:$0]  (!%p2117_p11), %s2629_s1, 48, %s156_s25, [#allocation6]  }
  0x1f   : > { %s1888_s9 = scalar_lea.vmem %s2121_s27, 3072  ;;  %p1896_p5 = scmp.lt.s32.totalorder %s2121_s27, %s2121_s27 }
  0x20   : > { %p1889_p1 = scmp.ne.s32.totalorder %s2121_s27, %s1888_s9  ;;  %p1897_p3 = scmp.lt.s32.totalorder %s1888_s9, %s1888_s9 }
  0x22   : > { %p1891_p13 = pnand %p1889_p1, %p1853_p12  ;;  %p1898_p9 = por %p1897_p3, %p1896_p5 }
  0x24   : > { %p1892_p0 = pneg %p1891_p13 }
  0x26   : > { %p1899_p7 = pnand %p1898_p9, %p1892_p0 }
  0x28   : > { %1902 = shalt.err (!%p1899_p7)
}
  0x29   : > { %s2034_s10 = smov 64   ;;  %s2035_s11 = smov 4  }
  0x2a   : > { %1731 = dma.hbm_to_vmem [thread:$0]  (!%p2117_p11), %s2630_s2, 3072, %s2121_s27, [#allocation6], %s2034_s10, %s2034_s10, %s2035_s11  }
  0x2b   : > { %s1914_s14 = scalar_lea.vmem %s179_s30, 3072  ;;  %p1922_p5 = scmp.lt.s32.totalorder %s179_s30, %s179_s30 }
  0x2c   : > { %p1915_p1 = scmp.ne.s32.totalorder %s179_s30, %s1914_s14  ;;  %p1923_p0 = scmp.lt.s32.totalorder %s1914_s14, %s1914_s14 }
  0x2e   : > { %p1917_p10 = pnand %p1915_p1, %p1853_p12  ;;  %p1924_p3 = por %p1923_p0, %p1922_p5 }
  0x30   : > { %p1918_p13 = pneg %p1917_p10 }
  0x32   : > { %p1925_p9 = pnand %p1924_p3, %p1918_p13 }
  0x34   : > { %1928 = shalt.err (!%p1925_p9)
}
  0x35   : > { %s2036_s20 = smov 192   ;;  %s2037_s24 = smov 12  }
  0x36   : > { %1734 = dma.hbm_to_vmem [thread:$0]  (!%p2117_p11), %s2631_s3, 3072, %s179_s30, [#allocation9], %s2036_s20, %s2036_s20, %s2037_s24  }
  0x37   : > { %s2155_s27 = sadd.s32 1, %s2029_s18   ;;  %s29_s5 = sadd.s32 1, %s2025_s17 }
  0x38   : > { %s26_s29 = ssub.s32 %s2029_s18, %s2155_s27  ;;  %p36_p7 = scmp.ne.s32.totalorder %s2025_s17, %s2021_s16 }
  0x39   : > { %p27_p12 = scmp.eq.s32.totalorder %s26_s29, 0  ;;  %p37_p1 = scmp.eq.s32.totalorder %s2029_s18, 0 }
  0x3a   : > { %p1746_p10 = scmp.lt.s32.totalorder %s2029_s18, 2  ;;  %p2169_p5 = por %p129_p2, %p36_p7 }
  0x3b   : > { %s2165_s6 = scalar_select %p27_p12, %s2025_s17, %s29_s5  }
  0x3c   : > { %p38_p13 = por %p37_p1, %p36_p7  ;;  %s192_s28 = sand.u32 1, %s2025_s17  }
  0x3d   : > { %s2661_s7 = scalar_select %p2169_p5, 1, 0 }
  0x3e   : > { %s1706_s8 = smul.u32 384, %s2029_s18  ;;  %p2175_p11 = pnand %p1746_p10, %p38_p13 }
  0x3f   : > { %s1705_s30 = smul.u32 24, %s192_s28  ;;  %s193_s20 = scalar_lea.sflag [#allocation3], %s192_s28 }
  0x40   : > { %s2182_s12 = scalar_lea.hbm %s2628_s0, %s1706_s8  ;;  %p1931_p0 = pneg %p2175_p11 }
  0x41   : > { %s196_s13 = scalar_lea.vmem [#allocation2], %s1705_s30  ;;  %s1929_s24 = scalar_lea.hbm %s2182_s12, 384 }
  0x42   : > { %s204_s14 = sshll.u32 %s196_s13, 4  ;;  %p1930_p2 = scmp.ne.s32.totalorder %s2182_s12, %s1929_s24  ;;  %s205_s14 = int_to_ptr.vmem [resolvable:$true] %s204_s14 }
  0x43   : > { %s1934_s29 = scalar_lea.hbm %s2628_s0, 768  ;;  %p1935_p12 = scmp.lt.s32.totalorder %s2182_s12, %s2628_s0 }
  0x44   : > { %p1932_p3 = pnand %p1931_p0, %p1930_p2  ;;  %p1936_p7 = scmp.lt.s32.totalorder %s1934_s29, %s1929_s24 }
  0x46   : > { %p1933_p9 = pneg %p1932_p3  ;;  %p1937_p1 = por %p1936_p7, %p1935_p12 }
  0x48   : > { %p1938_p10 = pnand %p1937_p1, %p1933_p9 }
  0x4a   : > { %1941 = shalt.err (!%p1938_p10)
}
  0x4b   : > { %s1942_s30 = scalar_lea.vmem %s205_s14, 384  ;;  %s2038_s28 = smov [#allocation2]  }
  0x4c   : > { %p1943_p13 = scmp.ne.s32.totalorder %s205_s14, %s1942_s30  ;;  %s1947_s10 = sshll.u32 %s2038_s28, 4  ;;  %s1948_s10 = int_to_ptr.vmem [resolvable:$false] %s1947_s10 }
  0x4d   : > { %s1949_s11 = scalar_lea.vmem %s1948_s10, 768  ;;  %p1950_p2 = scmp.lt.s32.totalorder %s205_s14, %s1948_s10 }
  0x4e   : > { %p1945_p6 = pnand %p1943_p13, %p1931_p0  ;;  %p1951_p3 = scmp.lt.s32.totalorder %s1949_s11, %s1942_s30 }
  0x50   : > { %p1946_p5 = pneg %p1945_p6  ;;  %p1952_p4 = por %p1951_p3, %p1950_p2 }
  0x52   : > { %p1953_p8 = pnand %p1952_p4, %p1946_p5 }
  0x54   : > { %1956 = shalt.err (!%p1953_p8)
}
  0x55   : > { %1738 = dma.hbm_to_vmem [thread:$0]  (!%p2175_p11), %s2182_s12, 384, %s205_s14, %s193_s20  }
  0x56   : > { %p2663_p9 = scmp.ne.s32.totalorder %s2659_s23, 0 }
  0x58   : > { %213 = sbr.rel (%p2663_p9) target bundleno = 1090 (0x442), region = 36 }
  0x5d   : > { %s2201_s13 = sand.u32 1, %s2021_s16   ;;  %p2664_p4 = scmp.ne.s32.totalorder %s2657_s21, 0 }
  0x5e   : > { %s1707_s24 = smul.u32 24, %s2201_s13  ;;  %s216_s25 = scalar_lea.sflag [#allocation3], %s2201_s13 }
  0x60   : > { %s2207_s26 = scalar_lea.vmem [#allocation2], %s1707_s24 }
  0x61   : > { %2000 = dma.done.wait (%p2664_p4), %s216_s25, 384  }
  0x62   : > { %2002 = vsyncadd (%p2664_p4), %s216_s25, 4294966912  ;;  %p2665_p6 = scmp.eq.s32.totalorder %s2089_s19, 0 }
  0x64   : > { %2004 = dma.done.wait (%p2665_p6), [#allocation6], 3120   ;;  %p2666_p8 = pmov %p2665_p6 }
  0x65   : > { %p2667_p5 = pmov %p2665_p6 }
  0x66   : > { %2006 = vsyncadd (%p2666_p8), [#allocation6], 4294964176 }
  0x67   : > { %2008 = dma.done.wait (%p2667_p5), [#allocation9], 3072   ;;  %p2668_p11 = pmov %p2667_p5 }
  0x68   : > { %v2641_v0 = vmov 0.0   ;;  %vm2040_vm0 = vmmov 0   ;;  %v2224_v1 = vld [vmem:[#allocation7 + $0x78] sm:$0xff]   ;;  %v2232_v4 = vld [vmem:[#allocation7 + $0x70] sm:$0xff]   ;;  %v2241_v7 = vld [vmem:[#allocation7 + $0x68] sm:$0xff]   ;;  %v2639_v55 = vmov 0  }
  0x69   : > { %2010 = vsyncadd (%p2668_p11), [#allocation9], 4294964224  ;;  %1565 = vmatprep.subr.bf16.mxu1 %v2641_v0  ;;  %1581 = vmatprep.mubr.msk.bf16.mxu1 %vm2040_vm0, %v2641_v0  ;;  %v2226_v2 = vld [vmem:[#allocation7 + $0xb8] sm:$0xff]   ;;  %v2236_v5 = vld [vmem:[#allocation7 + $0xb0] sm:$0xff]   ;;  %s1708_s21 = smul.u32 384, %s2089_s19  ;;  %s255_s23 = scalar_lea.vmem [#allocation10], %s1707_s24 }
  0x6a   : > { %1414 = vmatprep.subr.bf16.mxu0 %v2224_v1  ;;  %v2229_v3 = vld [vmem:[#allocation7 + $0x38] sm:$0xff]   ;;  %1566 = vmatpush3.bf16.msra.mxu1 %v2226_v2  ;;  %v2239_v6 = vld [vmem:[#allocation7 + $0x30] sm:$0xff]   ;;  %v2244_v8 = vld [vmem:[#allocation7 + $0xa8] sm:$0xff]   ;;  %s1253_s9 = sshll.u32 %s255_s23, 4  ;;  %s1239_s20 = scalar_lea.sflag [#allocation4], %s2201_s13  ;;  %s1254_s9 = int_to_ptr.vmem [resolvable:$true] %s1253_s9 }
  0x6b   : > { %1415 = vmatpush3.bf16.msra.mxu0 %v2229_v3  ;;  %1567 = vmatprep.subr.bf16.mxu1 %v2641_v0  ;;  %v2248_v9 = vld [vmem:[#allocation7 + $0x28] sm:$0xff]   ;;  %v2251_v10 = vld [vmem:[#allocation7 + $0x60] sm:$0xff]   ;;  %v2261_v13 = vld [vmem:[#allocation7 + $0x58] sm:$0xff]   ;;  %s1251_s19 = scalar_lea.hbm %s2632_s4, %s1708_s21  ;;  %s1957_s29 = scalar_lea.vmem %s1254_s9, 384 }
  0x6c   : > { %1416 = vmatprep.subr.bf16.mxu0 %v2232_v4  ;;  %v2254_v11 = vld [vmem:[#allocation7 + $0xa0] sm:$0xff]   ;;  %v2264_v14 = vld [vmem:[#allocation7 + $0x98] sm:$0xff]   ;;  %v2271_v16 = vld [vmem:[#allocation7 + $0x50] sm:$0xff]   ;;  %p1958_p0 = scmp.ne.s32.totalorder %s1254_s9, %s1957_s29  ;;  %p2689_p12 = scmp.ne.s32.totalorder %s2661_s7, 0 }
  0x6d   : > { %v2258_v12 = vld [vmem:[#allocation7 + $0x20] sm:$0xff]   ;;  %v2268_v15 = vld [vmem:[#allocation7 + $0x18] sm:$0xff]   ;;  %v2274_v17 = vld [vmem:[#allocation7 + $0x90] sm:$0xff]   ;;  %s2042_s5 = smov [#allocation10]  }
  0x6e   : > { %1568 = vmatpush3.bf16.msra.mxu1 %v2236_v5  ;;  %v2278_v18 = vld [vmem:[#allocation7 + $0x10] sm:$0xff]   ;;  %v2281_v19 = vld [vmem:[#allocation7 + $0x48] sm:$0xff]   ;;  %v2294_v23 = vld [vmem:[#allocation7 + $0x40] sm:$0xff]   ;;  %p1959_p7 = pnand %p1958_p0, %p2689_p12  ;;  %s1961_s8 = sshll.u32 %s2042_s5, 4  ;;  %s1962_s8 = int_to_ptr.vmem [resolvable:$false] %s1961_s8 }
  0x6f   : > { %1417 = vmatpush3.bf16.msra.mxu0 %v2239_v6  ;;  %1569 = vmatprep.subr.bf16.mxu1 %v2641_v0  ;;  %v2284_v20 = vld [vmem:[#allocation7 + $0x88] sm:$0xff]   ;;  %v2298_v25 = vld [vmem:[#allocation7 + $0x80] sm:$0xff]   ;;  %v2319_v32 = vld [vmem:[#allocation8 + $0xb0] ss:$12 sps:$4 sm:$0xff]   ;;  %s1963_s30 = scalar_lea.vmem %s1962_s8, 768  ;;  %p1964_p10 = scmp.lt.s32.totalorder %s1254_s9, %s1962_s8 }
  0x70   : > { %1418 = vmatprep.subr.bf16.mxu0 %v2241_v7  ;;  %v2288_v21 = vld [vmem:[#allocation7 + $0x8] sm:$0xff]   ;;  %v2302_v26 = vld [vmem:[%s2207_s26 + $0x10] sm:$0xff]  ;;  %v2348_v40 = vld [vmem:[#allocation8 + $0x64] ss:$12 sps:$4 sm:$0xff]   ;;  %p1960_p1 = pneg %p1959_p7  ;;  %p1965_p13 = scmp.lt.s32.totalorder %s1963_s30, %s1957_s29 }
  0x71   : > { %v2291_v22 = vld [vmem:[%s2207_s26 + $0x8] sm:$0xff]  ;;  %2669 = vst [vmem:[#allocation15_spill] sm:$0xff] %v2302_v26  ;;  %v2306_v27 = vld [vmem:[#allocation7] sm:$0xff]   ;;  %v342_v30 = vpack.c.bf16 %v2302_v26, %v2302_v26  ;;  %v2335_v37 = vld [vmem:[#allocation8 + $0x7c] ss:$12 sps:$4 sm:$0xff]  }
  0x72   : > { %1570 = vmatpush3.bf16.msra.mxu1 %v2244_v8  ;;  %v341_v24 = vpack.c.bf16 %v2291_v22, %v2291_v22  ;;  %v2309_v28 = vld [vmem:[%s2207_s26] sm:$0xff]  ;;  %v2326_v34 = vld [vmem:[#allocation8 + $0x94] ss:$12 sps:$4 sm:$0xff]   ;;  %p1966_p2 = por %p1965_p13, %p1964_p10 }
  0x73   : > { %1419 = vmatpush3.bf16.msra.mxu0 %v2248_v9  ;;  %1571 = vmatprep.subr.bf16.mxu1 %v2641_v0  ;;  %2670 = vst [vmem:[#allocation16_spill] sm:$0xff] %v2309_v28  ;;  %v2312_v29 = vld [vmem:[#allocation8 + $0xac] ss:$12 sps:$4 sm:$0xff]   ;;  %v340_v31 = vpack.c.bf16 %v2309_v28, %v2309_v28  ;;  %v2322_v33 = vld [vmem:[#allocation8 + $0xa8] ss:$12 sps:$4 sm:$0xff]  }
  0x74   : > { %1420 = vmatprep.subr.bf16.mxu0 %v2251_v10  ;;  %519 = vmatprep.mubr.bf16.mxu0 %v341_v24  ;;  %v2329_v35 = vld [vmem:[#allocation8 + $0x90] ss:$12 sps:$4 sm:$0xff]   ;;  %v2331_v36 = vld [vmem:[#allocation8 + $0x98] ss:$12 sps:$4 sm:$0xff]   ;;  %v2338_v38 = vld [vmem:[#allocation8 + $0x80] ss:$12 sps:$4 sm:$0xff]   ;;  %p1967_p3 = pnand %p1966_p2, %p1960_p1 }
  0x75   : > { %v2344_v39 = vld [vmem:[#allocation8 + $0x78] ss:$12 sps:$4 sm:$0xff]   ;;  %v2351_v41 = vld [vmem:[#allocation8 + $0x68] ss:$12 sps:$4 sm:$0xff]   ;;  %v2354_v42 = vld [vmem:[#allocation8 + $0x60] ss:$12 sps:$4 sm:$0xff]  }
  0x76   : > { %1572 = vmatpush3.bf16.msra.mxu1 %v2254_v11  ;;  %v2358_v43 = vld [vmem:[#allocation8 + $0x4c] ss:$12 sps:$4 sm:$0xff]   ;;  %v2361_v44 = vld [vmem:[#allocation8 + $0x50] ss:$12 sps:$4 sm:$0xff]   ;;  %v2364_v45 = vld [vmem:[#allocation8 + $0x48] ss:$12 sps:$4 sm:$0xff]  }
  0x77   : > { %1421 = vmatpush3.bf16.msra.mxu0 %v2258_v12  ;;  %1573 = vmatprep.subr.bf16.mxu1 %v2641_v0  ;;  %v2371_v46 = vld [vmem:[#allocation8 + $0x34] ss:$12 sps:$4 sm:$0xff]   ;;  %v2373_v47 = vld [vmem:[#allocation8 + $0x30] ss:$12 sps:$4 sm:$0xff]   ;;  %v2375_v48 = vld [vmem:[#allocation8 + $0x38] ss:$12 sps:$4 sm:$0xff]  }
  0x78   : > { %1422 = vmatprep.subr.bf16.mxu0 %v2261_v13  ;;  %2671 = vst [vmem:[#allocation17_spill] sm:$0xff] %v2373_v47  ;;  %v2380_v49 = vld [vmem:[#allocation8 + $0x1c] ss:$12 sps:$4 sm:$0xff]   ;;  %v2383_v50 = vld [vmem:[#allocation8 + $0x18] ss:$12 sps:$4 sm:$0xff]  }
  0x79   : > { %2672 = vst [vmem:[#allocation18_spill] sm:$0xff] %v2380_v49  ;;  %2673 = vst [vmem:[#allocation19_spill] sm:$0xff] %v2383_v50  ;;  %v2385_v51 = vld [vmem:[#allocation8 + $0x20] ss:$12 sps:$4 sm:$0xff]   ;;  %v2390_v52 = vld [vmem:[#allocation8 + $0x4] ss:$12 sps:$4 sm:$0xff]  }
  0x7a   : > { %1574 = vmatpush3.bf16.msra.mxu1 %v2264_v14  ;;  %2674 = vst [vmem:[#allocation20_spill] sm:$0xff] %v2385_v51  ;;  %2675 = vst [vmem:[#allocation21_spill] sm:$0xff] %v2390_v52  ;;  %v2393_v53 = vld [vmem:[#allocation8] ss:$12 sps:$4 sm:$0xff]   ;;  %v2395_v54 = vld [vmem:[#allocation8 + $0x8] ss:$12 sps:$4 sm:$0xff]  }
  0x7b   : > { %1423 = vmatpush3.bf16.msra.mxu0 %v2268_v15  ;;  %1575 = vmatprep.subr.bf16.mxu1 %v2641_v0  ;;  %2676 = vst [vmem:[#allocation22_spill] sm:$0xff] %v2393_v53  ;;  %2677 = vst [vmem:[#allocation23_spill] sm:$0xff] %v2395_v54 }
  0x7c   : > { %1424 = vmatprep.subr.bf16.mxu0 %v2271_v16 }
  0x7e   : > { %1576 = vmatpush3.bf16.msra.mxu1 %v2274_v17 }
  0x7f   : > { %1425 = vmatpush3.bf16.msra.mxu0 %v2278_v18  ;;  %1577 = vmatprep.subr.bf16.mxu1 %v2641_v0 }
  0x80   : > { %1426 = vmatprep.subr.bf16.mxu0 %v2281_v19 }
  0x82   : > { %1578 = vmatpush3.bf16.msra.mxu1 %v2284_v20 }
  0x83   : > { %1427 = vmatpush3.bf16.msra.mxu0 %v2288_v21  ;;  %1579 = vmatprep.subr.bf16.mxu1 %v2641_v0 }
  0x84   : > { %1428 = vmatprep.subr.bf16.mxu0 %v2294_v23 }
  0x86   : > { %1580 = vmatpush3.bf16.msra.mxu1 %v2298_v25 }
  0x87   : > { %1429 = vmatpush3.bf16.msra.mxu0 %v2306_v27  ;;  %1585 = vmatprep.subr.bf16.mxu1 %v2641_v0 }
  0x88   : > { %697 = vmatprep.subr.bf16.mxu0 %v2312_v29 }
  0x89   : > { %1582 = vmatmul.mubr.bf16.vlgmr.msra.gmra.mxu1 %v342_v30 }
  0x8a   : > { %520 = vmatmul.mubr.bf16.vlgmr.msra.gmra.mxu0 %v340_v31  ;;  %1586 = vmatpush3.bf16.msra.mxu1 %v2319_v32 }
  0x8b   : > { %698 = vmatpush1.bf16.msra.mxu0 %v2322_v33  ;;  %1587 = vmatprep.subr.bf16.mxu1 %v2641_v0 }
  0x8c   : > { %699 = vmatprep.subr.bf16.mxu0 %v2326_v34  ;;  %1601 = vmatprep.mubr.msk.bf16.mxu1 %vm2040_vm0, %v2641_v0 }
  0x8d   : > { %729 = vmatprep.mubr.bf16.mxu0 %v2639_v55 }
  0x8e   : > { %1588 = vmatpush3.bf16.msra.mxu1 %v2331_v36 }
  0x8f   : > { %700 = vmatpush1.bf16.msra.mxu0 %v2329_v35  ;;  %1589 = vmatprep.subr.bf16.mxu1 %v2641_v0 }
  0x90   : > { %701 = vmatprep.subr.bf16.mxu0 %v2335_v37 }
  0x92   : > { %1590 = vmatpush3.bf16.msra.mxu1 %v2338_v38 }
  0x93   : > { %702 = vmatpush1.bf16.msra.mxu0 %v2344_v39  ;;  %1591 = vmatprep.subr.bf16.mxu1 %v2641_v0 }
  0x94   : > { %703 = vmatprep.subr.bf16.mxu0 %v2348_v40 }
  0x96   : > { %1592 = vmatpush3.bf16.msra.mxu1 %v2351_v41 }
  0x97   : > { %704 = vmatpush1.bf16.msra.mxu0 %v2354_v42  ;;  %1593 = vmatprep.subr.bf16.mxu1 %v2641_v0 }
  0x98   : > { %705 = vmatprep.subr.bf16.mxu0 %v2358_v43 }
  0x9a   : > { %1594 = vmatpush3.bf16.msra.mxu1 %v2361_v44 }
  0x9b   : > { %706 = vmatpush1.bf16.msra.mxu0 %v2364_v45  ;;  %1595 = vmatprep.subr.bf16.mxu1 %v2641_v0 }
  0x9c   : > { %707 = vmatprep.subr.bf16.mxu0 %v2371_v46 }
  0x9e   : > { %1596 = vmatpush3.bf16.msra.mxu1 %v2375_v48 }
  0x9f   : > { %708 = vmatpush1.bf16.msra.mxu0 %v2373_v47  ;;  %1597 = vmatprep.subr.bf16.mxu1 %v2641_v0 }
  0xa0   : > { %709 = vmatprep.subr.bf16.mxu0 %v2380_v49 }
  0xa2   : > { %1598 = vmatpush3.bf16.msra.mxu1 %v2385_v51 }
  0xa3   : > { %710 = vmatpush1.bf16.msra.mxu0 %v2383_v50  ;;  %1599 = vmatprep.subr.bf16.mxu1 %v2641_v0 }
  0xa4   : > { %711 = vmatprep.subr.bf16.mxu0 %v2390_v52 }
  0xa6   : > { %1600 = vmatpush3.bf16.msra.mxu1 %v2395_v54 }
  0xa7   : > { %712 = vmatpush1.bf16.msra.mxu0 %v2393_v53  ;;  %1605 = vmatprep.subr.bf16.mxu1 %v2641_v0 }
  0xa8   : > { %1454 = vmatprep.subr.bf16.mxu0 %v2224_v1 }
 0x149   : > { %v561_v56 = vpop.f32.mrf.mxu1 }
 0x14a   : > { %v1430_v57 = vpop.f32.mrf.mxu0 }
 0x14b   : > { %v1583_v58 = vpop.f32.mrf.mxu1 }
 0x14c   : > { %v1431_v59 = vpop.f32.mrf.mxu0 }
 0x14d   : > { %v1432_v60 = vadd.f32 %v1431_v59, %v1430_v57  ;;  %v564_v61 = vpop.f32.mrf.mxu1 }
 0x14e   : > { %v1433_v62 = vpop.f32.mrf.mxu0 }
 0x14f   : > { %v562_v63 = vadd.f32 %v1432_v60, %v561_v56  ;;  %v1584_v24 = vpop.f32.mrf.mxu1 }
 0x150   : > { %v1434_v30 = vpop.f32.mrf.mxu0 }
 0x151   : > { %v567_v31 = vmul.f32 0.020833334, %v562_v63 }
 0x153   : > { %v568_v53 = vpack.c.bf16 %v567_v31, %v567_v31 }
 0x155   : > { %730 = vmatmul.mubr.bf16.vlgmr.msra.gmra.mxu0 %v568_v53  ;;  %1602 = vmatmul.mubr.bf16.vlgmr.msra.gmra.mxu1 %v568_v53 }
 0x156   : > { %1606 = vmatpush3.bf16.msra.mxu1 %v2226_v2  ;;  %1455 = vmatpush3.bf16.msra.mxu0 %v2229_v3 }
 0x157   : > { %1607 = vmatprep.subr.bf16.mxu1 %v2641_v0  ;;  %1456 = vmatprep.subr.bf16.mxu0 %v2232_v4 }
 0x158   : > { %1621 = vmatprep.mubr.msk.bf16.mxu1 %vm2040_vm0, %v2641_v0 }
 0x15a   : > { %1608 = vmatpush3.bf16.msra.mxu1 %v2236_v5  ;;  %1457 = vmatpush3.bf16.msra.mxu0 %v2239_v6 }
 0x15b   : > { %1609 = vmatprep.subr.bf16.mxu1 %v2641_v0  ;;  %1458 = vmatprep.subr.bf16.mxu0 %v2241_v7 }
 0x15e   : > { %1610 = vmatpush3.bf16.msra.mxu1 %v2244_v8  ;;  %1459 = vmatpush3.bf16.msra.mxu0 %v2248_v9 }
 0x15f   : > { %1611 = vmatprep.subr.bf16.mxu1 %v2641_v0  ;;  %1460 = vmatprep.subr.bf16.mxu0 %v2251_v10 }
 0x162   : > { %1612 = vmatpush3.bf16.msra.mxu1 %v2254_v11  ;;  %1461 = vmatpush3.bf16.msra.mxu0 %v2258_v12 }
 0x163   : > { %1613 = vmatprep.subr.bf16.mxu1 %v2641_v0  ;;  %1462 = vmatprep.subr.bf16.mxu0 %v2261_v13 }
 0x166   : > { %1614 = vmatpush3.bf16.msra.mxu1 %v2264_v14  ;;  %1463 = vmatpush3.bf16.msra.mxu0 %v2268_v15 }
 0x167   : > { %1615 = vmatprep.subr.bf16.mxu1 %v2641_v0  ;;  %1464 = vmatprep.subr.bf16.mxu0 %v2271_v16 }
 0x16a   : > { %1616 = vmatpush3.bf16.msra.mxu1 %v2274_v17  ;;  %1465 = vmatpush3.bf16.msra.mxu0 %v2278_v18 }
 0x16b   : > { %1617 = vmatprep.subr.bf16.mxu1 %v2641_v0  ;;  %1466 = vmatprep.subr.bf16.mxu0 %v2281_v19 }
 0x16e   : > { %1618 = vmatpush3.bf16.msra.mxu1 %v2284_v20  ;;  %1467 = vmatpush3.bf16.msra.mxu0 %v2288_v21 }
 0x16f   : > { %1619 = vmatprep.subr.bf16.mxu1 %v2641_v0  ;;  %1468 = vmatprep.subr.bf16.mxu0 %v2294_v23 }
 0x172   : > { %1620 = vmatpush3.bf16.msra.mxu1 %v2298_v25  ;;  %1469 = vmatpush3.bf16.msra.mxu0 %v2306_v27 }
 0x173   : > { %1625 = vmatprep.subr.bf16.mxu1 %v2641_v0  ;;  %1485 = vmatprep.subr.bf16.mxu0 %v2224_v1 }
 0x215   : > { %v731_v53 = vpop.f32.mrf.mxu0  ;;  %v772_v56 = vpop.f32.mrf.mxu1 }
 0x216   : > { %v2438_v57 = vsub.f32 %v2309_v28, %v731_v53  ;;  %v2441_v58 = vsub.f32 %v2302_v26, %v772_v56 }
 0x217   : > { %v733_v59 = vpop.f32.mrf.mxu0  ;;  %v1603_v60 = vpop.f32.mrf.mxu1 }
 0x218   : > { %v781_v61 = vmul.f32 %v2438_v57, %v2438_v57  ;;  %v783_v62 = vmul.f32 %v2441_v58, %v2441_v58  ;;  %v779_v63 = vsub.f32 %v2291_v22, %v733_v59  ;;  %v2678_v59 = vmov 0.0  }
 0x219   : > { %v735_v24 = vpop.f32.mrf.mxu0  ;;  %v775_v30 = vpop.f32.mrf.mxu1 }
 0x21a   : > { %v784_v31 = vpack.c.bf16 %v781_v61, %v781_v61  ;;  %v786_v55 = vpack.c.bf16 %v783_v62, %v783_v62  ;;  %v782_v0 = vmul.f32 %v779_v63, %v779_v63 }
 0x21b   : > { %v736_v53 = vpop.f32.mrf.mxu0  ;;  %v1604_v28 = vpop.f32.mrf.mxu1 }
 0x21c   : > { %v787_v54 = vunpack.c.l.bf16 %v784_v31  ;;  %v789_v56 = vunpack.c.l.bf16 %v786_v55  ;;  %v785_v26 = vpack.c.bf16 %v782_v0, %v782_v0 }
 0x21e   : > { %v792_v52 = vsub.f32 %v783_v62, %v789_v56  ;;  %v788_v60 = vunpack.c.l.bf16 %v785_v26  ;;  %v790_v50 = vsub.f32 %v781_v61, %v787_v54 }
 0x220   : > { %v795_v51 = vpack.c.bf16 %v792_v52, %v792_v52  ;;  %v791_v49 = vsub.f32 %v782_v0, %v788_v60  ;;  %v793_v24 = vpack.c.bf16 %v790_v50, %v790_v50  ;;  %v957_v0 = vpack.c.bf16 %v779_v63, %v779_v63 }
 0x222   : > { %1622 = vmatmul.mubr.bf16.vlgmr.msra.gmra.mxu1 %v795_v51  ;;  %v794_v47 = vpack.c.bf16 %v791_v49, %v791_v49 }
 0x223   : > { %1626 = vmatpush3.bf16.msra.mxu1 %v2226_v2  ;;  %1641 = vmatprep.mubr.msk.bf16.mxu1 %vm2040_vm0, %v2678_v59 }
 0x224   : > { %1627 = vmatprep.subr.bf16.mxu1 %v2678_v59  ;;  %828 = vmatprep.mubr.bf16.mxu0 %v794_v47 }
 0x225   : > { %829 = vmatmul.mubr.bf16.vlgmr.msra.gmra.mxu0 %v793_v24 }
 0x226   : > { %1486 = vmatpush3.bf16.msra.mxu0 %v2229_v3  ;;  %908 = vmatprep.mubr.bf16.mxu0 %v785_v26 }
 0x227   : > { %1628 = vmatpush3.bf16.msra.mxu1 %v2236_v5  ;;  %1487 = vmatprep.subr.bf16.mxu0 %v2232_v4 }
 0x228   : > { %1629 = vmatprep.subr.bf16.mxu1 %v2678_v59 }
 0x22a   : > { %1488 = vmatpush3.bf16.msra.mxu0 %v2239_v6 }
 0x22b   : > { %1630 = vmatpush3.bf16.msra.mxu1 %v2244_v8  ;;  %1489 = vmatprep.subr.bf16.mxu0 %v2241_v7 }
 0x22c   : > { %1631 = vmatprep.subr.bf16.mxu1 %v2678_v59 }
 0x22e   : > { %1490 = vmatpush3.bf16.msra.mxu0 %v2248_v9 }
 0x22f   : > { %1632 = vmatpush3.bf16.msra.mxu1 %v2254_v11  ;;  %1491 = vmatprep.subr.bf16.mxu0 %v2251_v10 }
 0x230   : > { %1633 = vmatprep.subr.bf16.mxu1 %v2678_v59 }
 0x232   : > { %1492 = vmatpush3.bf16.msra.mxu0 %v2258_v12 }
 0x233   : > { %1634 = vmatpush3.bf16.msra.mxu1 %v2264_v14  ;;  %1493 = vmatprep.subr.bf16.mxu0 %v2261_v13 }
 0x234   : > { %1635 = vmatprep.subr.bf16.mxu1 %v2678_v59 }
 0x236   : > { %1494 = vmatpush3.bf16.msra.mxu0 %v2268_v15 }
 0x237   : > { %1636 = vmatpush3.bf16.msra.mxu1 %v2274_v17  ;;  %1495 = vmatprep.subr.bf16.mxu0 %v2271_v16 }
 0x238   : > { %1637 = vmatprep.subr.bf16.mxu1 %v2678_v59 }
 0x23a   : > { %1496 = vmatpush3.bf16.msra.mxu0 %v2278_v18 }
 0x23b   : > { %1638 = vmatpush3.bf16.msra.mxu1 %v2284_v20  ;;  %1497 = vmatprep.subr.bf16.mxu0 %v2281_v19 }
 0x23c   : > { %1639 = vmatprep.subr.bf16.mxu1 %v2678_v59 }
 0x23e   : > { %1498 = vmatpush3.bf16.msra.mxu0 %v2288_v21 }
 0x23f   : > { %1640 = vmatpush3.bf16.msra.mxu1 %v2298_v25  ;;  %1499 = vmatprep.subr.bf16.mxu0 %v2294_v23 }
 0x240   : > { %1645 = vmatprep.subr.bf16.mxu1 %v2678_v59 }
 0x242   : > { %1500 = vmatpush3.bf16.msra.mxu0 %v2306_v27  ;;  %1642 = vmatmul.mubr.bf16.vlgmr.msra.gmra.mxu1 %v786_v55 }
 0x243   : > { %1646 = vmatpush3.bf16.msra.mxu1 %v2226_v2  ;;  %1516 = vmatprep.subr.bf16.mxu0 %v2224_v1  ;;  %v958_v1 = vpack.c.bf16 %v2441_v58, %v2441_v58  ;;  %v956_v2 = vpack.c.bf16 %v2438_v57, %v2438_v57 }
 0x244   : > { %1647 = vmatprep.subr.bf16.mxu1 %v2678_v59  ;;  %1661 = vmatprep.mubr.msk.bf16.mxu1 %vm2040_vm0, %v2678_v59 }
 0x245   : > { %909 = vmatmul.mubr.bf16.vlgmr.msra.gmra.mxu0 %v784_v31 }
 0x246   : > { %1517 = vmatpush3.bf16.msra.mxu0 %v2229_v3  ;;  %991 = vmatprep.mubr.bf16.mxu0 %v957_v0  ;;  %v2679_v3 = vmov 0  }
 0x247   : > { %1648 = vmatpush3.bf16.msra.mxu1 %v2236_v5  ;;  %1518 = vmatprep.subr.bf16.mxu0 %v2232_v4  ;;  %v2680_v4 = vld [vmem:[#allocation17_spill] sm:$0xff]  ;;  %v2681_v5 = vld [vmem:[#allocation18_spill] sm:$0xff] }
 0x248   : > { %1649 = vmatprep.subr.bf16.mxu1 %v2678_v59 }
 0x24a   : > { %1519 = vmatpush3.bf16.msra.mxu0 %v2239_v6  ;;  %v2682_v6 = vld [vmem:[#allocation20_spill] sm:$0xff] }
 0x24b   : > { %1650 = vmatpush3.bf16.msra.mxu1 %v2244_v8  ;;  %1520 = vmatprep.subr.bf16.mxu0 %v2241_v7  ;;  %v2683_v7 = vld [vmem:[#allocation19_spill] sm:$0xff]  ;;  %v2684_v8 = vld [vmem:[#allocation21_spill] sm:$0xff] }
 0x24c   : > { %1651 = vmatprep.subr.bf16.mxu1 %v2678_v59 }
 0x24e   : > { %1521 = vmatpush3.bf16.msra.mxu0 %v2248_v9  ;;  %v2685_v9 = vld [vmem:[#allocation23_spill] sm:$0xff] }
 0x24f   : > { %1652 = vmatpush3.bf16.msra.mxu1 %v2254_v11  ;;  %1522 = vmatprep.subr.bf16.mxu0 %v2251_v10  ;;  %v2686_v10 = vld [vmem:[#allocation22_spill] sm:$0xff] }
 0x250   : > { %1653 = vmatprep.subr.bf16.mxu1 %v2678_v59 }
 0x252   : > { %1523 = vmatpush3.bf16.msra.mxu0 %v2258_v12 }
 0x253   : > { %1654 = vmatpush3.bf16.msra.mxu1 %v2264_v14  ;;  %1524 = vmatprep.subr.bf16.mxu0 %v2261_v13 }
 0x254   : > { %1655 = vmatprep.subr.bf16.mxu1 %v2678_v59 }
 0x256   : > { %1525 = vmatpush3.bf16.msra.mxu0 %v2268_v15 }
 0x257   : > { %1656 = vmatpush3.bf16.msra.mxu1 %v2274_v17  ;;  %1526 = vmatprep.subr.bf16.mxu0 %v2271_v16 }
 0x258   : > { %1657 = vmatprep.subr.bf16.mxu1 %v2678_v59 }
 0x25a   : > { %1527 = vmatpush3.bf16.msra.mxu0 %v2278_v18 }
 0x25b   : > { %1658 = vmatpush3.bf16.msra.mxu1 %v2284_v20  ;;  %1528 = vmatprep.subr.bf16.mxu0 %v2281_v19 }
 0x25c   : > { %1659 = vmatprep.subr.bf16.mxu1 %v2678_v59 }
 0x25e   : > { %1529 = vmatpush3.bf16.msra.mxu0 %v2288_v21 }
 0x25f   : > { %1660 = vmatpush3.bf16.msra.mxu1 %v2298_v25  ;;  %1530 = vmatprep.subr.bf16.mxu0 %v2294_v23 }
 0x260   : > { %1665 = vmatprep.subr.bf16.mxu1 %v2678_v59 }
 0x262   : > { %1531 = vmatpush3.bf16.msra.mxu0 %v2306_v27  ;;  %1662 = vmatmul.mubr.bf16.vlgmr.msra.gmra.mxu1 %v958_v1 }
 0x263   : > { %1050 = vmatprep.subr.bf16.mxu0 %v2312_v29  ;;  %1666 = vmatpush3.bf16.msra.mxu1 %v2319_v32 }
 0x264   : > { %1667 = vmatprep.subr.bf16.mxu1 %v2678_v59  ;;  %1681 = vmatprep.mubr.msk.bf16.mxu1 %vm2040_vm0, %v2678_v59 }
 0x265   : > { %992 = vmatmul.mubr.bf16.vlgmr.msra.gmra.mxu0 %v956_v2 }
 0x266   : > { %1051 = vmatpush1.bf16.msra.mxu0 %v2322_v33  ;;  %1082 = vmatprep.mubr.bf16.mxu0 %v2679_v3 }
 0x267   : > { %1052 = vmatprep.subr.bf16.mxu0 %v2326_v34  ;;  %1668 = vmatpush3.bf16.msra.mxu1 %v2331_v36 }
 0x268   : > { %1669 = vmatprep.subr.bf16.mxu1 %v2678_v59 }
 0x26a   : > { %1053 = vmatpush1.bf16.msra.mxu0 %v2329_v35 }
 0x26b   : > { %1054 = vmatprep.subr.bf16.mxu0 %v2335_v37  ;;  %1670 = vmatpush3.bf16.msra.mxu1 %v2338_v38 }
 0x26c   : > { %1671 = vmatprep.subr.bf16.mxu1 %v2678_v59 }
 0x26e   : > { %1055 = vmatpush1.bf16.msra.mxu0 %v2344_v39 }
 0x26f   : > { %1056 = vmatprep.subr.bf16.mxu0 %v2348_v40  ;;  %1672 = vmatpush3.bf16.msra.mxu1 %v2351_v41 }
 0x270   : > { %1673 = vmatprep.subr.bf16.mxu1 %v2678_v59 }
 0x272   : > { %1057 = vmatpush1.bf16.msra.mxu0 %v2354_v42 }
 0x273   : > { %1058 = vmatprep.subr.bf16.mxu0 %v2358_v43  ;;  %1674 = vmatpush3.bf16.msra.mxu1 %v2361_v44 }
 0x274   : > { %1675 = vmatprep.subr.bf16.mxu1 %v2678_v59 }
 0x276   : > { %1059 = vmatpush1.bf16.msra.mxu0 %v2364_v45 }
 0x277   : > { %1060 = vmatprep.subr.bf16.mxu0 %v2371_v46  ;;  %1676 = vmatpush3.bf16.msra.mxu1 %v2375_v48 }
 0x278   : > { %1677 = vmatprep.subr.bf16.mxu1 %v2678_v59 }
 0x27a   : > { %1061 = vmatpush1.bf16.msra.mxu0 %v2680_v4 }
 0x27b   : > { %1062 = vmatprep.subr.bf16.mxu0 %v2681_v5  ;;  %1678 = vmatpush3.bf16.msra.mxu1 %v2682_v6 }
 0x27c   : > { %1679 = vmatprep.subr.bf16.mxu1 %v2678_v59 }
 0x27e   : > { %1063 = vmatpush1.bf16.msra.mxu0 %v2683_v7 }
 0x27f   : > { %1064 = vmatprep.subr.bf16.mxu0 %v2684_v8  ;;  %1680 = vmatpush3.bf16.msra.mxu1 %v2685_v9 }
 0x280   : > { %1685 = vmatprep.subr.bf16.mxu1 %v2678_v59 }
 0x282   : > { %1065 = vmatpush1.bf16.msra.mxu0 %v2686_v10 }
 0x283   : > { %1131 = vmatprep.subr.bf16.mxu0 %v2312_v29 }
 0x2e2   : > { %v870_v11 = vpop.f32.mrf.mxu1 }
 0x2e4   : > { %v1623_v12 = vpop.f32.mrf.mxu1 }
 0x2e5   : > { %v1470_v13 = vpop.f32.mrf.mxu0 }
 0x2e6   : > { %v873_v14 = vpop.f32.mrf.mxu1 }
 0x2e7   : > { %v1471_v15 = vpop.f32.mrf.mxu0 }
 0x2e8   : > { %v1624_v16 = vpop.f32.mrf.mxu1  ;;  %v1472_v17 = vadd.f32 %v1471_v15, %v1470_v13 }
 0x2e9   : > { %v1473_v18 = vpop.f32.mrf.mxu0 }
 0x2ea   : > { %v871_v19 = vadd.f32 %v1472_v17, %v870_v11 }
 0x2eb   : > { %v1474_v20 = vpop.f32.mrf.mxu0 }
 0x302   : > { %v950_v21 = vpop.f32.mrf.mxu1 }
 0x304   : > { %v1643_v23 = vpop.f32.mrf.mxu1 }
 0x305   : > { %v1501_v25 = vpop.f32.mrf.mxu0 }
 0x306   : > { %v953_v26 = vpop.f32.mrf.mxu1 }
 0x307   : > { %v1502_v27 = vpop.f32.mrf.mxu0 }
 0x308   : > { %v1644_v28 = vpop.f32.mrf.mxu1  ;;  %v1503_v50 = vadd.f32 %v1502_v27, %v1501_v25 }
 0x309   : > { %v1504_v47 = vpop.f32.mrf.mxu0 }
 0x30a   : > { %v911_v54 = vadd.f32 %v1503_v50, %v871_v19 }
 0x30b   : > { %v1505_v49 = vpop.f32.mrf.mxu0 }
 0x30c   : > { %v951_v63 = vadd.f32 %v950_v21, %v911_v54 }
 0x30e   : > { %v1040_v56 = vmul.f32 0.020833334, %v951_v63 }
 0x322   : > { %v1033_v29 = vpop.f32.mrf.mxu1 }
 0x324   : > { %v1663_v51 = vpop.f32.mrf.mxu1 }
 0x325   : > { %v1532_v52 = vpop.f32.mrf.mxu0 }
 0x326   : > { %v1036_v55 = vpop.f32.mrf.mxu1 }
 0x327   : > { %v1533_v57 = vpop.f32.mrf.mxu0 }
 0x328   : > { %v1534_v58 = vadd.f32 %v1533_v57, %v1532_v52  ;;  %v1664_v61 = vpop.f32.mrf.mxu1 }
 0x329   : > { %v1535_v62 = vpop.f32.mrf.mxu0 }
 0x32a   : > { %v1034_v30 = vadd.f32 %v1534_v58, %v1033_v29 }
 0x32b   : > { %v1536_v31 = vpop.f32.mrf.mxu0 }
 0x32c   : > { %v1039_v53 = vmul.f32 0.020833334, %v1034_v30 }
 0x32e   : > { %v1041_v60 = vmul.f32 %v1039_v53, %v1039_v53 }
 0x330   : > { %v1042_v24 = vsub.f32 %v1040_v56, %v1041_v60 }
 0x332   : > { %v1043_v0 = vmax.f32 %v1042_v24, 0.0 }
 0x334   : > { %v1044_v1 = vadd.f32 1e-05, %v1043_v0 }
 0x336   : > { %1849 = vrsqrt.f32 %v1044_v1 }
 0x343   : > { %v1850_v2 = vpop.eup %1849 }
 0x344   : > { %v1046_v11 = vpack.c.bf16 %v1850_v2, %v1850_v2 }
 0x346   : > { %v1047_v12 = vunpack.c.l.bf16 %v1046_v11 }
 0x348   : > { %v1048_v13 = vsub.f32 %v1850_v2, %v1047_v12 }
 0x34a   : > { %v1049_v14 = vpack.c.bf16 %v1048_v13, %v1048_v13 }
 0x34c   : > { %1083 = vmatmul.mubr.bf16.vlgmr.msra.gmra.mxu0 %v1049_v14  ;;  %1682 = vmatmul.mubr.bf16.vlgmr.msra.gmra.mxu1 %v1049_v14 }
 0x34d   : > { %1132 = vmatpush1.bf16.msra.mxu0 %v2322_v33  ;;  %1686 = vmatpush3.bf16.msra.mxu1 %v2319_v32 }
 0x34e   : > { %1133 = vmatprep.subr.bf16.mxu0 %v2326_v34  ;;  %1687 = vmatprep.subr.bf16.mxu1 %v2678_v59 }
 0x34f   : > { %1163 = vmatprep.mubr.bf16.mxu0 %v2679_v3  ;;  %1701 = vmatprep.mubr.msk.bf16.mxu1 %vm2040_vm0, %v2678_v59 }
 0x351   : > { %1134 = vmatpush1.bf16.msra.mxu0 %v2329_v35  ;;  %1688 = vmatpush3.bf16.msra.mxu1 %v2331_v36 }
 0x352   : > { %1135 = vmatprep.subr.bf16.mxu0 %v2335_v37  ;;  %1689 = vmatprep.subr.bf16.mxu1 %v2678_v59 }
 0x355   : > { %1136 = vmatpush1.bf16.msra.mxu0 %v2344_v39  ;;  %1690 = vmatpush3.bf16.msra.mxu1 %v2338_v38 }
 0x356   : > { %1137 = vmatprep.subr.bf16.mxu0 %v2348_v40  ;;  %1691 = vmatprep.subr.bf16.mxu1 %v2678_v59  ;;  %v1217_v40 = vlaneseq }
 0x359   : > { %1138 = vmatpush1.bf16.msra.mxu0 %v2354_v42  ;;  %1692 = vmatpush3.bf16.msra.mxu1 %v2351_v41  ;;  %v1218_v41 = vshrl.u32 %v1217_v40, 7 }
 0x35a   : > { %1139 = vmatprep.subr.bf16.mxu0 %v2358_v43  ;;  %1693 = vmatprep.subr.bf16.mxu1 %v2678_v59 }
 0x35b   : > { %v1219_v42 = vsub.s32 0, %v1218_v41  ;;  %v1227_v43 = vsub.s32 2, %v1218_v41 }
 0x35d   : > { %1140 = vmatpush1.bf16.msra.mxu0 %v2364_v45  ;;  %1694 = vmatpush3.bf16.msra.mxu1 %v2361_v44  ;;  %v1215_v44 = vld [vmem:[#allocation5] sm:$0x7]  ;;  %v1223_v45 = vsub.s32 1, %v1218_v41 }
 0x35e   : > { %1141 = vmatprep.subr.bf16.mxu0 %v2371_v46  ;;  %1695 = vmatprep.subr.bf16.mxu1 %v2678_v59  ;;  %v1220_v3 = vrot.slane %v1215_v44, %v1219_v42 }
 0x35f   : > { %v1224_v17 = vrot.slane %v1215_v44, %v1223_v45 }
 0x361   : > { %1142 = vmatpush1.bf16.msra.mxu0 %v2680_v4  ;;  %1696 = vmatpush3.bf16.msra.mxu1 %v2375_v48 }
 0x362   : > { %1143 = vmatprep.subr.bf16.mxu0 %v2681_v5  ;;  %1697 = vmatprep.subr.bf16.mxu1 %v2678_v59  ;;  %v1228_v5 = vrot.slane %v1215_v44, %v1227_v43 }
 0x365   : > { %1144 = vmatpush1.bf16.msra.mxu0 %v2683_v7  ;;  %1698 = vmatpush3.bf16.msra.mxu1 %v2682_v6 }
 0x366   : > { %1145 = vmatprep.subr.bf16.mxu0 %v2684_v8  ;;  %1699 = vmatprep.subr.bf16.mxu1 %v2678_v59  ;;  %v2687_v8 = vld [vmem:[#allocation16_spill] sm:$0xff] }
 0x369   : > { %1146 = vmatpush1.bf16.msra.mxu0 %v2686_v10  ;;  %1700 = vmatpush3.bf16.msra.mxu1 %v2685_v9  ;;  %v2688_v10 = vld [vmem:[#allocation15_spill] sm:$0xff] }
 0x36c   : > { %1164 = vmatmul.mubr.bf16.vlgmr.msra.gmra.mxu0 %v1046_v11  ;;  %1702 = vmatmul.mubr.bf16.vlgmr.msra.gmra.mxu1 %v1046_v11 }
 0x40c   : > { %v1084_v32 = vpop.f32.mrf.mxu0  ;;  %v1125_v33 = vpop.f32.mrf.mxu1 }
 0x40e   : > { %v1086_v34 = vpop.f32.mrf.mxu0  ;;  %v1683_v35 = vpop.f32.mrf.mxu1 }
 0x410   : > { %v1088_v36 = vpop.f32.mrf.mxu0  ;;  %v1128_v37 = vpop.f32.mrf.mxu1 }
 0x412   : > { %v1089_v38 = vpop.f32.mrf.mxu0  ;;  %v1684_v39 = vpop.f32.mrf.mxu1 }
 0x42c   : > { %v1165_v46 = vpop.f32.mrf.mxu0  ;;  %v1206_v48 = vpop.f32.mrf.mxu1 }
 0x42d   : > { %v1166_v59 = vadd.f32 %v1165_v46, %v1084_v32  ;;  %v1207_v4 = vadd.f32 %v1206_v48, %v1125_v33 }
 0x42e   : > { %v1167_v6 = vpop.f32.mrf.mxu0  ;;  %v1703_v7 = vpop.f32.mrf.mxu1 }
 0x42f   : > { %v1212_v9 = vmul.f32 %v1166_v59, %v2687_v8  ;;  %v1214_v15 = vmul.f32 %v1207_v4, %v2688_v10  ;;  %v1168_v16 = vadd.f32 %v1167_v6, %v1086_v34 }
 0x430   : > { %v1169_v18 = vpop.f32.mrf.mxu0  ;;  %v1209_v19 = vpop.f32.mrf.mxu1 }
 0x431   : > { %v1232_v20 = vmul.f32 %v1220_v3, %v1212_v9  ;;  %v1234_v21 = vmul.f32 %v1228_v5, %v1214_v15  ;;  %v1213_v23 = vmul.f32 %v1168_v16, %v2291_v22 }
 0x432   : > { %v1170_v25 = vpop.f32.mrf.mxu0  ;;  %v1704_v26 = vpop.f32.mrf.mxu1 }
 0x433   : > { %1235 = vst [vmem:[%s255_s23] sm:$0xff] %v1232_v20  ;;  %1237 = vst [vmem:[%s255_s23 + $0x10] sm:$0xff] %v1234_v21  ;;  %v1233_v27 = vmul.f32 %v1224_v17, %v1213_v23 }
 0x435   : > { %1236 = vst [vmem:[%s255_s23 + $0x8] sm:$0xff] %v1233_v27 }
 0x436   : > { %1970 = shalt.err (!%p1967_p3)
}
 0x437   : > { %s1971_s28 = scalar_lea.hbm %s1251_s19, 384  ;;  %s1975_s13 = scalar_lea.hbm %s2632_s4, 768 }
 0x438   : > { %p1972_p9 = scmp.ne.s32.totalorder %s1251_s19, %s1971_s28  ;;  %p1976_p8 = scmp.lt.s32.totalorder %s1251_s19, %s2632_s4 }
 0x439   : > { %p1977_p5 = scmp.lt.s32.totalorder %s1975_s13, %s1971_s28 }
 0x43a   : > { %p1973_p4 = pnand %p1972_p9, %p2689_p12 }
 0x43b   : > { %p1978_p11 = por %p1977_p5, %p1976_p8 }
 0x43c   : > { %p1974_p6 = pneg %p1973_p4 }
 0x43e   : > { %p1979_p0 = pnand %p1978_p11, %p1974_p6 }
 0x440   : > { %1982 = shalt.err (!%p1979_p0)
}
 0x441   : > { %1723 = dma.vmem_to_hbm [thread:$0]  (%p2689_p12), %s1254_s9, 384, %s1251_s19, %s1239_s20  }
 0x442 PF: > { %s1265_s26 = sand.u32 1, %s2017_s15   ;;  %p2690_p7 = scmp.ne.s32.totalorder %s2658_s22, 0 }
 0x443   : > { %p2691_p1 = scmp.ge.s32.totalorder %s2029_s18, 2  ;;  %s1266_s21 = scalar_lea.sflag [#allocation4], %s1265_s26 }
 0x445   : > { %p1740_p10 = pnand %p2691_p1, %p2690_p7 }
 0x447   : > { %p1741_p13 = pneg %p1740_p10 }
 0x449   : > { %2012 = dma.done.wait (%p1741_p13), %s1266_s21, 384  }
 0x44a   : > { %2014 = vsyncadd (%p1741_p13), %s1266_s21, 4294966912  ;;  %p19_p2 = scmp.ge.s32.totalorder %s2155_s27, 4   ;;  %s2692_s15 = smov %s2021_s16 }
 0x44b   : > { %s2693_s16 = smov %s2025_s17  ;;  %s2694_s17 = smov %s2165_s6 }
 0x44c   : > { %s2695_s18 = smov %s2155_s27  ;;  %21 = sbr.rel (!%p19_p2) target bundleno = 7 (0x7), region = 93 }
 0x451   :  { %1271 = vsyncpa [#allocation3], 1 }
 0x452   :  { %1273 = vsyncpa [#allocation3 + $0x1], 1 }
 0x453   :  { %1274 = vsyncpa [#allocation6], 1 }
 0x454   :  { %1275 = vsyncpa [#allocation9], 1 }
 0x455   :  { %1276 = vsyncpa [#allocation4], 1 }
 0x456   :  { %1278 = vsyncpa [#allocation4 + $0x1], 1 }

</bundles_post_ra>
